<compile_context>
chip_gen: v5e
topology: v5e:2x2
jax: 0.10.0
libtpu: 0.0.40
codegen_flags: <defaults>
</compile_context>

<pallas_src>
import math

import jax
import jax.numpy as jnp
from jax.experimental import pallas as pl
from jax.experimental.pallas import tpu as pltpu


# ----------------------------- kernel body ---------------------------------


def _cond_embedder_kernel(x_ref, w1_ref, b1_ref, w2_ref, b2_ref, o_ref):
    # x: [TB, Cp] (mm_dtype); w1: [Cp, Hp], w2: [Hp, Hp] pre-transposed to
    # MXU-native RHS layout.  All accumulation / bias / SiLU in float32.
    h = jnp.dot(x_ref[...], w1_ref[...], preferred_element_type=jnp.float32)
    h = h + b1_ref[...]
    h = h * jax.nn.sigmoid(h)          # SiLU: sigmoid on EUP, multiply on VPU
    y = jnp.dot(h.astype(w2_ref.dtype), w2_ref[...],
                preferred_element_type=jnp.float32)
    o_ref[...] = (y + b2_ref[...]).astype(o_ref.dtype)


# ------------------------------ helpers -------------------------------------


def _round_up(n, m):
    return ((n + m - 1) // m) * m


def _cdiv(a, b):
    return (a + b - 1) // b


def _pad_axis(x, axis, target):
    pad = target - x.shape[axis]
    if pad == 0:
        return x
    widths = [(0, 0)] * x.ndim
    widths[axis] = (0, pad)
    return jnp.pad(x, widths)


def _vmem_capacity_bytes():
    try:
        info = pltpu.get_tpu_info()
        cap = getattr(info, "vmem_capacity_bytes", None)
        if cap:
            return int(cap)
    except Exception:
        pass
    return 128 * 1024 * 1024  # conservative default (v5e/v6e)


# -------------------------- wrapper / launcher -------------------------------


def prepare_cond_embedder_params(w1, b1, w2, b2, *, matmul_dtype=jnp.bfloat16):
    """One-time weight preparation (pad -> transpose -> cast).

    w1: [hidden, cond_dim]  (PyTorch nn.Linear layout)
    b1: [hidden]
    w2: [hidden, hidden]
    b2: [hidden]
    Returns prepared params with weights in MXU-native [K, N] layout, padded
    to lane-dense multiples of 128, in `matmul_dtype`; biases in float32.
    """
    hidden, cond_dim = w1.shape
    Cp = _round_up(cond_dim, 128)
    Hp = _round_up(hidden, 128)
    w1_t = _pad_axis(_pad_axis(w1, 1, Cp), 0, Hp).T.astype(matmul_dtype)  # [Cp, Hp]
    w2_t = _pad_axis(_pad_axis(w2, 1, Hp), 0, Hp).T.astype(matmul_dtype)  # [Hp, Hp]
    b1_p = _pad_axis(b1, 0, Hp).astype(jnp.float32).reshape(1, Hp)
    b2_p = _pad_axis(b2, 0, Hp).astype(jnp.float32).reshape(1, Hp)
    return {"w1_t": w1_t, "b1": b1_p, "w2_t": w2_t, "b2": b2_p,
            "cond_dim": cond_dim, "hidden": hidden}


def cond_embedder_apply(cond, params, *, block_b=None, single_buffer_weights=None):
    """Fused Linear -> SiLU -> Linear with pre-prepared weights.

    cond: [B, cond_dim]; returns [B, hidden] in cond.dtype.
    """
    w1_t, b1_p = params["w1_t"], params["b1"]
    w2_t, b2_p = params["w2_t"], params["b2"]
    cond_dim, hidden = params["cond_dim"], params["hidden"]

    B, cd = cond.shape
    assert cd == cond_dim, f"cond_dim mismatch: {cd} vs {cond_dim}"
    Cp, Hp = w1_t.shape
    mm_dtype = w1_t.dtype
    out_dtype = cond.dtype
    mm_size = jnp.dtype(mm_dtype).itemsize
    out_size = jnp.dtype(out_dtype).itemsize

    vmem_cap = _vmem_capacity_bytes()
    if block_b is None:
        # Larger batch tiles on 128-MiB-VMEM chips (v5e/v6e); 256 on v7x.
        block_b = 512 if vmem_cap >= 96 * 1024 * 1024 else 256

    # Sublane-aligned batch tile for the MXU-input dtype (8 f32 / 16 bf16 / 32 i8).
    sublane = 8 * max(1, 4 // mm_size)
    if B <= sublane:
        TB = sublane
    else:
        # Aim for >= 2 grid steps so the "parallel" axis can shard across the
        # two TensorCores on v7x (near-free on single-TC chips).
        TB = min(_round_up(block_b, sublane), _round_up(_cdiv(B, 2), sublane))
    num_tiles = _cdiv(B, TB)

    # Per-call activation work: feature-dim pad + cast only (no batch pad;
    # Pallas masks the ragged last tile).
    x_p = _pad_axis(cond, 1, Cp).astype(mm_dtype)

    weight_bytes = (w1_t.size + w2_t.size) * mm_size + (b1_p.size + b2_p.size) * 4
    if single_buffer_weights is None:
        # Single-buffer grid-invariant weights only when double-buffering them
        # would eat a large VMEM fraction (e.g. hidden>=2048 on v7x).
        single_buffer_weights = (2 * weight_bytes) > (vmem_cap // 4)

    def _w_spec(shape):
        if single_buffer_weights:
            return pl.BlockSpec(shape, lambda i: (0, 0),
                                pipeline_mode=pl.Buffered(1))
        return pl.BlockSpec(shape, lambda i: (0, 0))

    weight_buffers = 1 if single_buffer_weights else 2
    stream_bytes = 2 * TB * Cp * mm_size + 2 * TB * Hp * out_size
    scratch_bytes = 2 * TB * Hp * 4  # f32 h / y intermediates
    needed = weight_buffers * weight_bytes + stream_bytes + scratch_bytes
    # Generation-aware cap with headroom: ~56 MiB on v7x, ~112 MiB on v5e/v6e.
    vmem_limit = int(min(vmem_cap * 7 // 8, max(needed + (4 << 20), 16 << 20)))

    cost = pl.CostEstimate(
        flops=2 * B * Hp * (Cp + Hp),
        transcendentals=B * Hp,  # sigmoid
        bytes_accessed=x_p.size * mm_size + weight_bytes + B * Hp * out_size,
    )

    out = pl.pallas_call(
        _cond_embedder_kernel,
        out_shape=jax.ShapeDtypeStruct((B, Hp), out_dtype),
        grid=(num_tiles,),
        in_specs=[
            pl.BlockSpec((TB, Cp), lambda i: (i, 0)),   # x: streams over batch
            _w_spec((Cp, Hp)),                          # w1^T: VMEM-resident
            _w_spec((1, Hp)),                           # b1
            _w_spec((Hp, Hp)),                          # w2^T: VMEM-resident
            _w_spec((1, Hp)),                           # b2
        ],
        out_specs=pl.BlockSpec((TB, Hp), lambda i: (i, 0)),
        compiler_params=pltpu.CompilerParams(
            dimension_semantics=("parallel",),
            vmem_limit_bytes=vmem_limit,
        ),
        cost_estimate=cost,
    )(x_p, w1_t, b1_p, w2_t, b2_p)

    return out if hidden == Hp else out[:, :hidden]


def cond_embedder(cond, w1, b1, w2, b2, *, matmul_dtype=jnp.bfloat16,
                  block_b=None):
    """Convenience one-shot wrapper (prepares weights per call).

    In a real model, call prepare_cond_embedder_params once at init and
    cond_embedder_apply per step.
    """
    params = prepare_cond_embedder_params(w1, b1, w2, b2,
                                          matmul_dtype=matmul_dtype)
    return cond_embedder_apply(cond, params, block_b=block_b)


# ------------------------------- demo ---------------------------------------


def _init_linear(key, in_features, out_features):
    # Deterministic PyTorch-style init: U(-1/sqrt(in), 1/sqrt(in))
    kw, kb = jax.random.split(key)
    bound = 1.0 / math.sqrt(in_features)
    w = jax.random.uniform(kw, (out_features, in_features),
                           minval=-bound, maxval=bound, dtype=jnp.float32)
    b = jax.random.uniform(kb, (out_features,),
                           minval=-bound, maxval=bound, dtype=jnp.float32)
    return w, b


if __name__ == "__main__":
    cond_dim = 8
    hidden_dim = 32
    batch = 2

    key = jax.random.PRNGKey(0)
    k_cond, k_l1, k_l2 = jax.random.split(key, 3)

    cond = jax.random.normal(k_cond, (batch, cond_dim), dtype=jnp.float32)
    w1, b1 = _init_linear(k_l1, cond_dim, hidden_dim)
    w2, b2 = _init_linear(k_l2, hidden_dim, hidden_dim)

    # Reference in plain JAX (same math as the PyTorch module).
    h_ref = cond @ w1.T + b1
    h_ref = h_ref * jax.nn.sigmoid(h_ref)
    ref = h_ref @ w2.T + b2

    # f32 MXU path: tight check against the reference.
    params_f32 = prepare_cond_embedder_params(w1, b1, w2, b2,
                                              matmul_dtype=jnp.float32)
    out_f32 = jax.block_until_ready(cond_embedder_apply(cond, params_f32))
    assert out_f32.shape == (batch, hidden_dim)
    assert jnp.allclose(out_f32, ref, atol=1e-5, rtol=1e-5)

    # Default bf16 MXU path (f32 accumulation / bias / SiLU): loose check.
    params_bf16 = prepare_cond_embedder_params(w1, b1, w2, b2)
    out_bf16 = jax.block_until_ready(cond_embedder_apply(cond, params_bf16))
    assert out_bf16.shape == (batch, hidden_dim)
    assert jnp.allclose(out_bf16, ref, atol=1e-1, rtol=1e-1)

    # Convenience one-shot wrapper still works.
    out_once = jax.block_until_ready(cond_embedder(cond, w1, b1, w2, b2))
    assert out_once.shape == (batch, hidden_dim)
    assert jnp.allclose(out_once, ref, atol=1e-1, rtol=1e-1)

    print("KERNEL_OK")
</pallas_src>

<mosaic_0001>
module attributes {stable_mosaic.version = 11 : i64} {
  func.func @_cond_embedder_kernel(%arg0: i32, %arg1: memref<8x128xf32, #tpu.memory_space<vmem>>, %arg2: memref<128x128xf32, #tpu.memory_space<vmem>>, %arg3: memref<1x128xf32, #tpu.memory_space<vmem>>, %arg4: memref<128x128xf32, #tpu.memory_space<vmem>>, %arg5: memref<1x128xf32, #tpu.memory_space<vmem>>, %arg6: memref<8x128xf32, #tpu.memory_space<vmem>>) attributes {dimension_semantics = [#tpu.dimension_semantics<parallel>], iteration_bounds = array<i64: 1>, scalar_prefetch = 0 : i64, scratch_operands = 0 : i64, tpu.core_type = #tpu.core_type<tc>, window_params = [{transform_indices = @transform_0, window_bounds = array<i64: 8, 128>}, {pipeline_mode = #tpu.pipeline_mode<synchronous>, transform_indices = @transform_1, window_bounds = array<i64: 128, 128>}, {pipeline_mode = #tpu.pipeline_mode<synchronous>, transform_indices = @transform_2, window_bounds = array<i64: 1, 128>}, {pipeline_mode = #tpu.pipeline_mode<synchronous>, transform_indices = @transform_3, window_bounds = array<i64: 128, 128>}, {pipeline_mode = #tpu.pipeline_mode<synchronous>, transform_indices = @transform_4, window_bounds = array<i64: 1, 128>}, {transform_indices = @transform_5, window_bounds = array<i64: 8, 128>}]} {
    %c0 = arith.constant 0 : index
    %c0_0 = arith.constant 0 : index
    %0 = vector.load %arg1[%c0, %c0_0] : memref<8x128xf32, #tpu.memory_space<vmem>>, vector<8x128xf32>
    %c0_1 = arith.constant 0 : index
    %c0_2 = arith.constant 0 : index
    %1 = vector.load %arg2[%c0_1, %c0_2] : memref<128x128xf32, #tpu.memory_space<vmem>>, vector<128x128xf32>
    %cst = arith.constant dense<0.000000e+00> : vector<8x128xf32>
    %2 = tpu.matmul %0, %1, %cst {dimension_numbers = #tpu.dot_dimension_numbers<[1], [0], [0], [1], [0, 0, 1, 1], [], []>} : vector<8x128xf32>, vector<128x128xf32>, vector<8x128xf32> -> vector<8x128xf32>
    %c0_3 = arith.constant 0 : index
    %c0_4 = arith.constant 0 : index
    %3 = vector.load %arg3[%c0_3, %c0_4] : memref<1x128xf32, #tpu.memory_space<vmem>>, vector<1x128xf32>
    %4 = vector.broadcast %3 : vector<1x128xf32> to vector<8x128xf32>
    %5 = arith.addf %2, %4 : vector<8x128xf32>
    %6 = arith.negf %5 : vector<8x128xf32>
    %7 = math.exp %6 : vector<8x128xf32>
    %cst_5 = arith.constant 1.000000e+00 : f32
    %8 = vector.broadcast %cst_5 : f32 to vector<8x128xf32>
    %9 = arith.addf %8, %7 : vector<8x128xf32>
    %10 = arith.divf %8, %9 : vector<8x128xf32>
    %11 = arith.mulf %5, %10 : vector<8x128xf32>
    %c0_6 = arith.constant 0 : index
    %c0_7 = arith.constant 0 : index
    %12 = vector.load %arg4[%c0_6, %c0_7] : memref<128x128xf32, #tpu.memory_space<vmem>>, vector<128x128xf32>
    %cst_8 = arith.constant dense<0.000000e+00> : vector<8x128xf32>
    %13 = tpu.matmul %11, %12, %cst_8 {dimension_numbers = #tpu.dot_dimension_numbers<[1], [0], [0], [1], [0, 0, 1, 1], [], []>} : vector<8x128xf32>, vector<128x128xf32>, vector<8x128xf32> -> vector<8x128xf32>
    %c0_9 = arith.constant 0 : index
    %c0_10 = arith.constant 0 : index
    %14 = vector.load %arg5[%c0_9, %c0_10] : memref<1x128xf32, #tpu.memory_space<vmem>>, vector<1x128xf32>
    %15 = vector.broadcast %14 : vector<1x128xf32> to vector<8x128xf32>
    %16 = arith.addf %13, %15 : vector<8x128xf32>
    %c0_11 = arith.constant 0 : index
    %c0_12 = arith.constant 0 : index
    %17 = vector.load %arg6[%c0_11, %c0_12] : memref<8x128xf32, #tpu.memory_space<vmem>>, vector<8x128xf32>
    tpu.vector_store %arg6[%c0_11, %c0_12], %16 {strides = array<i32>} : memref<8x128xf32, #tpu.memory_space<vmem>>, vector<8x128xf32>,
    return
  }
  func.func @transform_0(%arg0: i32) -> (i32, i32) {
    %c0_i32 = arith.constant 0 : i32
    %c0_i32_0 = arith.constant 0 : i32
    return %arg0, %c0_i32 : i32, i32
  }
  func.func @transform_1(%arg0: i32) -> (i32, i32) {
    %c0_i32 = arith.constant 0 : i32
    %c0_i32_0 = arith.constant 0 : i32
    %c0_i32_1 = arith.constant 0 : i32
    return %c0_i32, %c0_i32_0 : i32, i32
  }
  func.func @transform_2(%arg0: i32) -> (i32, i32) {
    %c0_i32 = arith.constant 0 : i32
    %c0_i32_0 = arith.constant 0 : i32
    %c0_i32_1 = arith.constant 0 : i32
    return %c0_i32, %c0_i32_0 : i32, i32
  }
  func.func @transform_3(%arg0: i32) -> (i32, i32) {
    %c0_i32 = arith.constant 0 : i32
    %c0_i32_0 = arith.constant 0 : i32
    %c0_i32_1 = arith.constant 0 : i32
    return %c0_i32, %c0_i32_0 : i32, i32
  }
  func.func @transform_4(%arg0: i32) -> (i32, i32) {
    %c0_i32 = arith.constant 0 : i32
    %c0_i32_0 = arith.constant 0 : i32
    %c0_i32_1 = arith.constant 0 : i32
    return %c0_i32, %c0_i32_0 : i32, i32
  }
  func.func @transform_5(%arg0: i32) -> (i32, i32) {
    %c0_i32 = arith.constant 0 : i32
    %c0_i32_0 = arith.constant 0 : i32
    return %arg0, %c0_i32 : i32, i32
  }
}

</mosaic_0001>

<bundles_post_ra>
// kernel: tpu_custom_call.1
= control target key start
LH: loop header
LB: loop body
LE: loop exit
PB: predicated region body
PF: predicated region fallthrough
CT: control target
= control target key end

     0   :  { %10 = vsyncpa [#allocation3], 0  ;;  %s369_s0 = inlined_call_operand.hbm [shape: f32[2,128], index: 0, kind: input, shape index: {}]   ;;  %s370_s1 = inlined_call_operand.hbm [shape: f32[128,128], index: 1, kind: input, shape index: {}]   ;;  %s371_s2 = inlined_call_operand.vmem [shape: f32[1,128], index: 2, kind: input, shape index: {}]   ;;  %s372_s3 = inlined_call_operand.hbm [shape: f32[128,128], index: 3, kind: input, shape index: {}]   ;;  %s373_s4 = inlined_call_operand.vmem [shape: f32[1,128], index: 4, kind: input, shape index: {}]   ;;  %s374_s5 = inlined_call_operand.hbm [shape: f32[2,128], index: 5, kind: output, shape index: {}]  }
   0x1   :  { %11 = vsyncpa [#allocation6], 0 }
   0x2   :  { %12 = vsyncpa [#allocation4], 0  ;;  %s30_s20 = sshll.u32 %s370_s1, 4  ;;  %s31_s20 = int_to_ptr.hbm [resolvable:$true] %s30_s20 }
   0x3   :  { %16 = vsyncadd [#allocation3], 96  ;;  %s307_s21 = smov [#allocation5]   ;;  %s17_s25 = sshll.u32 %s369_s0, 4  ;;  %s18_s25 = int_to_ptr.hbm [resolvable:$true] %s17_s25 }
   0x4   :  { %s32_s22 = sshll.u32 %s307_s21, 4  ;;  %s308_s26 = smov 128   ;;  %s33_s22 = int_to_ptr.vmem [resolvable:$true] %s32_s22 }
   0x5   :  { %s309_s27 = smov 8   ;;  %s310_s28 = smov [#allocation2]  }
   0x6   :  { %38 = dma.hbm_to_vmem [thread:$0]  %s31_s20, 2048, %s33_s22, [#allocation6], %s308_s26, %s308_s26, %s309_s27  }
   0x7   :  { %s19_s29 = sshll.u32 %s310_s28, 4  ;;  %s311_s30 = smov 32   ;;  %s20_s29 = int_to_ptr.vmem [resolvable:$true] %s19_s29 }
   0x8   :  { %s312_s6 = smov 2   ;;  %s45_s8 = sshll.u32 %s372_s3, 4  ;;  %s46_s8 = int_to_ptr.hbm [resolvable:$true] %s45_s8 }
   0x9   :  { %25 = dma.hbm_to_vmem [thread:$0]  %s18_s25, 32, %s20_s29, [#allocation3], %s311_s30, %s311_s30, %s312_s6  }
   0xa   :  { %s313_s9 = smov [#allocation7]  }
   0xb   :  { %s47_s0 = sshll.u32 %s313_s9, 4  ;;  %s48_s0 = int_to_ptr.vmem [resolvable:$true] %s47_s0 }
   0xc   :  { %53 = dma.hbm_to_vmem [thread:$0]  %s46_s8, 2048, %s48_s0, [#allocation6], %s308_s26, %s308_s26, %s309_s27  }
   0xd   :  { %301 = dma.done.wait [#allocation3], 128  }
   0xe   :  { %302 = vsyncadd [#allocation3], 4294967168 }
   0xf   :  { %303 = dma.done.wait [#allocation6], 4096  }
  0x10   :  { %304 = vsyncadd [#allocation6], 4294963200  ;;  %v84_v0 = vld [vmem:[#allocation5 + $0x78] sm:$0xff]  ;;  %v83_v1 = vld [vmem:[#allocation5 + $0x70] sm:$0xff] }
  0x11   :  { %89 = vmatpush.msra.mxu0 %v84_v0  ;;  %v82_v2 = vld [vmem:[#allocation5 + $0x68] sm:$0xff]  ;;  %v81_v3 = vld [vmem:[#allocation5 + $0x60] sm:$0xff]  ;;  %v80_v4 = vld [vmem:[#allocation5 + $0x58] sm:$0xff] }
  0x12   :  { %v79_v5 = vld [vmem:[#allocation5 + $0x50] sm:$0xff]  ;;  %v78_v6 = vld [vmem:[#allocation5 + $0x48] sm:$0xff]  ;;  %v77_v7 = vld [vmem:[#allocation5 + $0x40] sm:$0xff] }
  0x13   :  { %90 = vmatpush.msra.mxu0 %v83_v1  ;;  %v76_v8 = vld [vmem:[#allocation5 + $0x38] sm:$0xff]  ;;  %v75_v9 = vld [vmem:[#allocation5 + $0x30] sm:$0xff]  ;;  %v74_v10 = vld [vmem:[#allocation5 + $0x28] sm:$0xff] }
  0x14   :  { %v73_v11 = vld [vmem:[#allocation5 + $0x20] sm:$0xff]  ;;  %v72_v12 = vld [vmem:[#allocation5 + $0x18] sm:$0xff]  ;;  %v71_v13 = vld [vmem:[#allocation5 + $0x10] sm:$0xff] }
  0x15   :  { %91 = vmatpush.msra.mxu0 %v82_v2  ;;  %v70_v14 = vld [vmem:[#allocation5 + $0x8] sm:$0xff]  ;;  %v69_v15 = vld [vmem:[#allocation5] sm:$0xff]  ;;  %v68_v16 = vld [vmem:[#allocation2] sm:$0xff] }
  0x16   :  { %v144_v17 = vld [vmem:[#allocation7 + $0x78] sm:$0xff]  ;;  %v143_v18 = vld [vmem:[#allocation7 + $0x70] sm:$0xff]  ;;  %v142_v19 = vld [vmem:[#allocation7 + $0x68] sm:$0xff] }
  0x17   :  { %92 = vmatpush.msra.mxu0 %v81_v3  ;;  %149 = vmatpush.msra.mxu1 %v144_v17  ;;  %v141_v20 = vld [vmem:[#allocation7 + $0x60] sm:$0xff]  ;;  %v140_v21 = vld [vmem:[#allocation7 + $0x58] sm:$0xff]  ;;  %v139_v22 = vld [vmem:[#allocation7 + $0x50] sm:$0xff] }
  0x18   :  { %v138_v23 = vld [vmem:[#allocation7 + $0x48] sm:$0xff]  ;;  %v137_v24 = vld [vmem:[#allocation7 + $0x40] sm:$0xff]  ;;  %v136_v25 = vld [vmem:[#allocation7 + $0x38] sm:$0xff] }
  0x19   :  { %93 = vmatpush.msra.mxu0 %v80_v4  ;;  %150 = vmatpush.msra.mxu1 %v143_v18  ;;  %v135_v26 = vld [vmem:[#allocation7 + $0x30] sm:$0xff]  ;;  %v134_v27 = vld [vmem:[#allocation7 + $0x28] sm:$0xff]  ;;  %v133_v28 = vld [vmem:[#allocation7 + $0x20] sm:$0xff] }
  0x1a   :  { %v132_v29 = vld [vmem:[#allocation7 + $0x18] sm:$0xff]  ;;  %v131_v30 = vld [vmem:[#allocation7 + $0x10] sm:$0xff]  ;;  %v130_v31 = vld [vmem:[#allocation7 + $0x8] sm:$0xff] }
  0x1b   :  { %94 = vmatpush.msra.mxu0 %v79_v5  ;;  %151 = vmatpush.msra.mxu1 %v142_v19  ;;  %v199_v32 = vld [vmem:[%s371_s2] ss:$0 sm:$0xff]  ;;  %v129_v33 = vld [vmem:[#allocation7] sm:$0xff] }
  0x1c   :  { %v200_v50 = vld [vmem:[%s373_s4] ss:$0 sm:$0xff] }
  0x1d   :  { %95 = vmatpush.msra.mxu0 %v78_v6  ;;  %152 = vmatpush.msra.mxu1 %v141_v20 }
  0x1f   :  { %96 = vmatpush.msra.mxu0 %v77_v7  ;;  %153 = vmatpush.msra.mxu1 %v140_v21 }
  0x21   :  { %97 = vmatpush.msra.mxu0 %v76_v8  ;;  %154 = vmatpush.msra.mxu1 %v139_v22 }
  0x23   :  { %98 = vmatpush.msra.mxu0 %v75_v9  ;;  %155 = vmatpush.msra.mxu1 %v138_v23 }
  0x25   :  { %99 = vmatpush.msra.mxu0 %v74_v10  ;;  %156 = vmatpush.msra.mxu1 %v137_v24 }
  0x27   :  { %100 = vmatpush.msra.mxu0 %v73_v11  ;;  %157 = vmatpush.msra.mxu1 %v136_v25 }
  0x29   :  { %101 = vmatpush.msra.mxu0 %v72_v12  ;;  %158 = vmatpush.msra.mxu1 %v135_v26 }
  0x2b   :  { %102 = vmatpush.msra.mxu0 %v71_v13  ;;  %159 = vmatpush.msra.mxu1 %v134_v27 }
  0x2d   :  { %103 = vmatpush.msra.mxu0 %v70_v14  ;;  %160 = vmatpush.msra.mxu1 %v133_v28 }
  0x2f   :  { %104 = vmatpush.msra.mxu0 %v69_v15  ;;  %161 = vmatpush.msra.mxu1 %v132_v29 }
  0x30   :  { %105 = vmatmul.f32.vlgmr.msra.gmra.mxu0 %v68_v16 }
  0x31   :  { %162 = vmatpush.msra.mxu1 %v131_v30 }
  0x33   :  { %163 = vmatpush.msra.mxu1 %v130_v31 }
  0x35   :  { %164 = vmatpush.msra.mxu1 %v129_v33 }
  0xad   :  { %v106_v34 = vpop.f32.mrf.mxu0 }
  0xae   :  { %v107_v35 = vadd.f32 %v199_v32, %v106_v34 }
  0xb0   :  { %v190_v36 = vmul.f32 -1.442695, %v107_v35 }
  0xb2   :  { %201 = vpow2.f32 %v190_v36 }
  0xb8   :  { %v202_v37 = vpop.eup %201 }
  0xb9   :  { %v112_v38 = vadd.f32 1.0, %v202_v37 }
  0xbb   :  { %203 = vrcp.f32 %v112_v38  ;;  %v124_v42 = vand.u32 2147483648, %v112_v38  ;;  %v122_v44 = vand.u32 2147483647, %v112_v38  ;;  %vm118_vm1 = vweird.f32 %v112_v38 }
  0xbd   :  { %v125_v46 = vor.u32 1.1754944e-38, %v124_v42  ;;  %vm123_vm3 = vcmp.eq.f32.partialorder %v122_v44, 8.507059e+37 }
  0xc1   :  { %v204_v39 = vpop.eup %203 }
  0xc2   :  { %v114_v40 = vmul.f32 %v204_v39, %v112_v38  ;;  %vm119_vm0 = vweird.f32 %v204_v39 }
  0xc3   :  { %vm120_vm2 = vmor %vm118_vm1, %vm119_vm0 }
  0xc4   :  { %v115_v41 = vsub.f32 1.0, %v114_v40 }
  0xc6   :  { %v116_v43 = vmul.f32 %v204_v39, %v115_v41 }
  0xc8   :  { %v117_v45 = vadd.f32 %v204_v39, %v116_v43 }
  0xca   :  { %v121_v47 = vsel %vm120_vm2, %v204_v39, %v117_v45 }
  0xcb   :  { %v126_v48 = vsel %vm123_vm3, %v125_v46, %v121_v47 }
  0xcc   :  { %v128_v49 = vmul.f32 %v126_v48, %v107_v35 }
  0xce   :  { %165 = vmatmul.f32.vlgmr.msra.gmra.mxu1 %v128_v49 }
 0x14b   :  { %v166_v51 = vpop.f32.mrf.mxu1 }
 0x14c   :  { %v167_v52 = vadd.f32 %v200_v50, %v166_v51 }
 0x14e   :  { %169 = vst [vmem:[#allocation8] sm:$0xff] %v167_v52 }
 0x14f   :  { %173 = vsyncadd [#allocation4], 96  ;;  %s176_s14 = sshll.u32 %s374_s5, 4  ;;  %s314_s15 = smov [#allocation8]   ;;  %s177_s14 = int_to_ptr.hbm [resolvable:$true] %s176_s14 }
 0x150   :  { %s174_s16 = sshll.u32 %s314_s15, 4  ;;  %s175_s16 = int_to_ptr.vmem [resolvable:$true] %s174_s16 }
 0x151   :  { %182 = dma.vmem_to_hbm [thread:$0]  %s175_s16, 32, %s177_s14, [#allocation4], %s311_s30, %s311_s30, %s312_s6  }
 0x152   :  { %305 = dma.done.wait [#allocation4], 128  }
 0x153   :  { %306 = vsyncadd [#allocation4], 4294967168 }
 0x154   :  { %187 = vsyncpa [#allocation3], 1 }
 0x155   :  { %188 = vsyncpa [#allocation6], 1 }
 0x156   :  { %189 = vsyncpa [#allocation4], 1 }

</bundles_post_ra>
